<compile_context>
chip_gen: v6e
topology: v6e:2x2x1
jax: 0.10.0
libtpu: 0.0.40
codegen_flags: <defaults>
</compile_context>

<pallas_src>
import functools

import jax
import jax.numpy as jnp
from jax import lax
from jax.experimental import pallas as pl
from jax.experimental.pallas import tpu as pltpu


def _basic_block_kernel(x_ref, w1_ref, b1_ref, w2_ref, b2_ref, o_ref,
                        xpad_ref, mid_ref, *, H, W, Cin, Cout):
    """Fused BasicBlock forward for one image (one grid step).

    x_ref   : (1, H, W*Cin)           f32  input block (also the residual)
    w1_ref  : (9*W*Cin,  W*Cout)      bf16 conv1 block-diag weights (BN1 scale folded)
    b1_ref  : (1, W*Cout)             f32  BN1 shift, tiled over W
    w2_ref  : (9*W*Cout, W*Cout)      bf16 conv2 block-diag weights (BN2 scale folded)
    b2_ref  : (1, W*Cout)             f32  BN2 shift, tiled over W
    o_ref   : (1, H, W*Cout)          f32  output block
    xpad_ref: VMEM (H+2, (W+2)*Cin)   bf16 zero-haloed input scratch
    mid_ref : VMEM (H+2, (W+2)*Cout)  bf16 zero-haloed conv1-output scratch
    """
    bf16 = xpad_ref.dtype

    x = x_ref[0]                                             # (H, W*Cin) f32

    # ---- padded input: zero the 1-pixel halo only, then fill the interior ----
    xpad_ref[0:1, :] = jnp.zeros((1, (W + 2) * Cin), bf16)
    xpad_ref[H + 1:H + 2, :] = jnp.zeros((1, (W + 2) * Cin), bf16)
    xpad_ref[:, 0:Cin] = jnp.zeros((H + 2, Cin), bf16)
    xpad_ref[:, (W + 1) * Cin:(W + 2) * Cin] = jnp.zeros((H + 2, Cin), bf16)
    xpad_ref[1:H + 1, Cin:(W + 1) * Cin] = x.astype(bf16)

    def conv(pad_ref, w_ref, c):
        # 9 taps -> one lane-concatenated im2col slab -> one MXU matmul.
        taps = []
        for ky in range(3):
            for kx in range(3):
                taps.append(pad_ref[ky:ky + H, kx * c:kx * c + W * c])
        patches = jnp.concatenate(taps, axis=-1)             # (H, 9*W*c) bf16
        return jnp.dot(patches, w_ref[...],
                       preferred_element_type=jnp.float32)   # (H, W*Cout) f32

    # ---- conv1 (3x3, pad=1) + folded BN1 + ReLU ----
    y1 = jnp.maximum(conv(xpad_ref, w1_ref, Cin) + b1_ref[...], 0.0)

    # ---- stage conv1 output (padded, bf16) in VMEM for conv2 ----
    mid_ref[0:1, :] = jnp.zeros((1, (W + 2) * Cout), bf16)
    mid_ref[H + 1:H + 2, :] = jnp.zeros((1, (W + 2) * Cout), bf16)
    mid_ref[:, 0:Cout] = jnp.zeros((H + 2, Cout), bf16)
    mid_ref[:, (W + 1) * Cout:(W + 2) * Cout] = jnp.zeros((H + 2, Cout), bf16)
    mid_ref[1:H + 1, Cout:(W + 1) * Cout] = y1.astype(bf16)

    # ---- conv2 (3x3, pad=1) + folded BN2 + f32 residual + ReLU ----
    y2 = jnp.maximum(conv(mid_ref, w2_ref, Cout) + b2_ref[...] + x, 0.0)
    o_ref[0] = y2


def _fold_bn(gamma, beta, mean, var, eps=1e-5):
    scale = gamma / jnp.sqrt(var + eps)
    shift = beta - mean * scale
    return scale, shift


def _block_diag_conv_weight(w_hwio, width):
    """(3,3,Ci,Co) HWIO -> (9*W*Ci, W*Co) block-diagonal-over-W matmul weight.

    Row index = (ky*3+kx)*W*Ci + w*Ci + ci ; col index = w*Co + co.
    Lets one matmul over lane-flattened (H, 9*W*Ci) patches compute all W
    output pixels of a row at once.
    """
    ci, co = w_hwio.shape[2], w_hwio.shape[3]
    eye = jnp.eye(width, dtype=w_hwio.dtype)
    wbig = jnp.einsum('yxio,wv->yxwivo', w_hwio, eye)        # (3,3,W,Ci,W,Co)
    return wbig.reshape(9 * width * ci, width * co)


def basic_block_forward(x_nchw, params):
    """BasicBlock.forward (stride=1, downsample=None), NCHW in / NCHW out."""
    N, C, H, W = x_nchw.shape
    # NCHW -> NHWC -> lane-flattened (N, H, W*C); wrapper reshapes are free.
    x = jnp.transpose(x_nchw, (0, 2, 3, 1)).reshape(N, H, W * C)
    x = x.astype(jnp.float32)

    s1, b1 = _fold_bn(params["bn1_gamma"], params["bn1_beta"],
                      params["bn1_mean"], params["bn1_var"])
    s2, b2 = _fold_bn(params["bn2_gamma"], params["bn2_beta"],
                      params["bn2_mean"], params["bn2_var"])

    Cin, Cout = params["w1"].shape[2], params["w1"].shape[3]
    assert Cin == C and params["w2"].shape[2] == Cout
    assert Cin == Cout, "residual path requires inplanes == planes (stride=1)"

    # Fold BN scale into the weights, build block-diag matmul weights, bf16.
    w1 = _block_diag_conv_weight(params["w1"] * s1, W).astype(jnp.bfloat16)
    w2 = _block_diag_conv_weight(params["w2"] * s2, W).astype(jnp.bfloat16)
    b1t = jnp.tile(b1, W).reshape(1, W * Cout).astype(jnp.float32)
    b2t = jnp.tile(b2, W).reshape(1, W * Cout).astype(jnp.float32)

    kernel = functools.partial(_basic_block_kernel,
                               H=H, W=W, Cin=Cin, Cout=Cout)

    out = pl.pallas_call(
        kernel,
        out_shape=jax.ShapeDtypeStruct((N, H, W * Cout), jnp.float32),
        grid=(N,),  # >= 2 steps: lets v7x shard across TensorCores
        in_specs=[
            pl.BlockSpec((1, H, W * Cin), lambda g: (g, 0, 0)),
            pl.BlockSpec((9 * W * Cin, W * Cout), lambda g: (0, 0)),
            pl.BlockSpec((1, W * Cout), lambda g: (0, 0)),
            pl.BlockSpec((9 * W * Cout, W * Cout), lambda g: (0, 0)),
            pl.BlockSpec((1, W * Cout), lambda g: (0, 0)),
        ],
        out_specs=pl.BlockSpec((1, H, W * Cout), lambda g: (g, 0, 0)),
        scratch_shapes=[
            pltpu.VMEM((H + 2, (W + 2) * Cin), jnp.bfloat16),
            pltpu.VMEM((H + 2, (W + 2) * Cout), jnp.bfloat16),
        ],
        compiler_params=pltpu.CompilerParams(
            dimension_semantics=("parallel",),
            # Fits v7x's 64 MiB physical VMEM; above every scoped default.
            vmem_limit_bytes=48 * 1024 * 1024),
    )(x, w1, b1t, w2, b2t)

    out = out.reshape(N, H, W, Cout)
    return jnp.transpose(out, (0, 3, 1, 2))  # NHWC -> NCHW


def _reference_forward(x_nchw, params):
    """Pure-JAX f32 reference (lax conv + inference BN) for verification."""
    x = jnp.transpose(x_nchw, (0, 2, 3, 1))
    dn = ("NHWC", "HWIO", "NHWC")

    def conv(a, w):
        return lax.conv_general_dilated(a, w, (1, 1), "SAME",
                                        dimension_numbers=dn)

    def bn(a, g, b, m, v, eps=1e-5):
        return (a - m) / jnp.sqrt(v + eps) * g + b

    out = conv(x, params["w1"])
    out = bn(out, params["bn1_gamma"], params["bn1_beta"],
             params["bn1_mean"], params["bn1_var"])
    out = jnp.maximum(out, 0.0)
    out = conv(out, params["w2"])
    out = bn(out, params["bn2_gamma"], params["bn2_beta"],
             params["bn2_mean"], params["bn2_var"])
    out = out + x
    out = jnp.maximum(out, 0.0)
    return jnp.transpose(out, (0, 3, 1, 2))


def make_params(key, inplanes, planes):
    ks = jax.random.split(key, 8)
    return {
        "w1": 0.1 * jax.random.normal(ks[0], (3, 3, inplanes, planes),
                                      jnp.float32),
        "w2": 0.1 * jax.random.normal(ks[1], (3, 3, planes, planes),
                                      jnp.float32),
        "bn1_gamma": 1.0 + 0.1 * jax.random.normal(ks[2], (planes,),
                                                   jnp.float32),
        "bn1_beta": 0.05 * jax.random.normal(ks[3], (planes,), jnp.float32),
        "bn1_mean": 0.02 * jax.random.normal(ks[4], (planes,), jnp.float32),
        "bn1_var": 1.0 + 0.1 * jnp.abs(jax.random.normal(ks[5], (planes,),
                                                         jnp.float32)),
        "bn2_gamma": 1.0 + 0.1 * jax.random.normal(ks[6], (planes,),
                                                   jnp.float32),
        "bn2_beta": 0.05 * jax.random.normal(ks[7], (planes,), jnp.float32),
        "bn2_mean": jnp.zeros((planes,), jnp.float32),
        "bn2_var": jnp.ones((planes,), jnp.float32),
    }


if __name__ == "__main__":
    N, C, H, W = 2, 4, 16, 16   # inplanes = planes = 4, stride = 1
    key = jax.random.PRNGKey(0)
    kx, kp = jax.random.split(key)
    x = jax.random.normal(kx, (N, C, H, W), jnp.float32)
    params = make_params(kp, inplanes=C, planes=C)

    out = jax.block_until_ready(basic_block_forward(x, params))
    ref = jax.block_until_ready(_reference_forward(x, params))

    assert out.shape == (N, C, H, W)
    # bf16 MXU inputs (f32 accumulation) -> slightly looser tolerance than
    # the pure-f32 reference.
    assert jnp.allclose(out, ref, atol=2e-2, rtol=2e-2), (
        float(jnp.max(jnp.abs(out - ref))))

    print("KERNEL_OK")
</pallas_src>

<mosaic_0001>
module attributes {stable_mosaic.version = 11 : i64} {
  func.func @_basic_block_kernel(%arg0: i32, %arg1: memref<1x16x64xf32, #tpu.memory_space<vmem>>, %arg2: memref<576x64xbf16, #tpu.memory_space<vmem>>, %arg3: memref<1x64xf32, #tpu.memory_space<vmem>>, %arg4: memref<576x64xbf16, #tpu.memory_space<vmem>>, %arg5: memref<1x64xf32, #tpu.memory_space<vmem>>, %arg6: memref<1x16x64xf32, #tpu.memory_space<vmem>>, %arg7: memref<18x72xbf16, #tpu.memory_space<vmem>>, %arg8: memref<18x72xbf16, #tpu.memory_space<vmem>>) attributes {dimension_semantics = [#tpu.dimension_semantics<parallel>], iteration_bounds = array<i64: 2>, scalar_prefetch = 0 : i64, scratch_operands = 2 : i64, tpu.core_type = #tpu.core_type<tc>, window_params = [{transform_indices = @transform_0, window_bounds = array<i64: 1, 16, 64>}, {pipeline_mode = #tpu.pipeline_mode<synchronous>, transform_indices = @transform_1, window_bounds = array<i64: 576, 64>}, {pipeline_mode = #tpu.pipeline_mode<synchronous>, transform_indices = @transform_2, window_bounds = array<i64: 1, 64>}, {pipeline_mode = #tpu.pipeline_mode<synchronous>, transform_indices = @transform_3, window_bounds = array<i64: 576, 64>}, {pipeline_mode = #tpu.pipeline_mode<synchronous>, transform_indices = @transform_4, window_bounds = array<i64: 1, 64>}, {transform_indices = @transform_5, window_bounds = array<i64: 1, 16, 64>}]} {
    %c0 = arith.constant 0 : index
    %c0_0 = arith.constant 0 : index
    %c0_1 = arith.constant 0 : index
    %0 = vector.load %arg1[%c0, %c0_0, %c0_1] : memref<1x16x64xf32, #tpu.memory_space<vmem>>, vector<1x16x64xf32>
    %1 = vector.shape_cast %0 : vector<1x16x64xf32> to vector<16x64xf32>
    %cst = arith.constant 0.000000e+00 : bf16
    %2 = vector.broadcast %cst : bf16 to vector<1x72xbf16>
    %c0_2 = arith.constant 0 : index
    %c0_3 = arith.constant 0 : index
    %3 = vector.load %arg7[%c0_2, %c0_3] : memref<18x72xbf16, #tpu.memory_space<vmem>>, vector<1x72xbf16>
    tpu.vector_store %arg7[%c0_2, %c0_3], %2 {strides = array<i32>} : memref<18x72xbf16, #tpu.memory_space<vmem>>, vector<1x72xbf16>,
    %cst_4 = arith.constant 0.000000e+00 : bf16
    %4 = vector.broadcast %cst_4 : bf16 to vector<1x72xbf16>
    %c17 = arith.constant 17 : index
    %c0_5 = arith.constant 0 : index
    %5 = vector.load %arg7[%c17, %c0_5] : memref<18x72xbf16, #tpu.memory_space<vmem>>, vector<1x72xbf16>
    tpu.vector_store %arg7[%c17, %c0_5], %4 {strides = array<i32>} : memref<18x72xbf16, #tpu.memory_space<vmem>>, vector<1x72xbf16>,
    %cst_6 = arith.constant 0.000000e+00 : bf16
    %6 = vector.broadcast %cst_6 : bf16 to vector<18x4xbf16>
    %c0_7 = arith.constant 0 : index
    %c0_8 = arith.constant 0 : index
    %7 = vector.load %arg7[%c0_7, %c0_8] : memref<18x72xbf16, #tpu.memory_space<vmem>>, vector<18x4xbf16>
    tpu.vector_store %arg7[%c0_7, %c0_8], %6 {strides = array<i32>} : memref<18x72xbf16, #tpu.memory_space<vmem>>, vector<18x4xbf16>,
    %cst_9 = arith.constant 0.000000e+00 : bf16
    %8 = vector.broadcast %cst_9 : bf16 to vector<18x4xbf16>
    %c0_10 = arith.constant 0 : index
    %c68 = arith.constant 68 : index
    %9 = vector.load %arg7[%c0_10, %c68] : memref<18x72xbf16, #tpu.memory_space<vmem>>, vector<18x4xbf16>
    tpu.vector_store %arg7[%c0_10, %c68], %8 {strides = array<i32>} : memref<18x72xbf16, #tpu.memory_space<vmem>>, vector<18x4xbf16>,
    %10 = arith.truncf %1 : vector<16x64xf32> to vector<16x64xbf16>
    %c1 = arith.constant 1 : index
    %c4 = arith.constant 4 : index
    %11 = vector.load %arg7[%c1, %c4] : memref<18x72xbf16, #tpu.memory_space<vmem>>, vector<16x64xbf16>
    tpu.vector_store %arg7[%c1, %c4], %10 {strides = array<i32>} : memref<18x72xbf16, #tpu.memory_space<vmem>>, vector<16x64xbf16>,
    %c0_11 = arith.constant 0 : index
    %c0_12 = arith.constant 0 : index
    %12 = vector.load %arg7[%c0_11, %c0_12] : memref<18x72xbf16, #tpu.memory_space<vmem>>, vector<16x64xbf16>
    %c0_13 = arith.constant 0 : index
    %c4_14 = arith.constant 4 : index
    %13 = vector.load %arg7[%c0_13, %c4_14] : memref<18x72xbf16, #tpu.memory_space<vmem>>, vector<16x64xbf16>
    %c0_15 = arith.constant 0 : index
    %c8 = arith.constant 8 : index
    %14 = vector.load %arg7[%c0_15, %c8] : memref<18x72xbf16, #tpu.memory_space<vmem>>, vector<16x64xbf16>
    %c1_16 = arith.constant 1 : index
    %c0_17 = arith.constant 0 : index
    %15 = vector.load %arg7[%c1_16, %c0_17] : memref<18x72xbf16, #tpu.memory_space<vmem>>, vector<16x64xbf16>
    %c1_18 = arith.constant 1 : index
    %c4_19 = arith.constant 4 : index
    %16 = vector.load %arg7[%c1_18, %c4_19] : memref<18x72xbf16, #tpu.memory_space<vmem>>, vector<16x64xbf16>
    %c1_20 = arith.constant 1 : index
    %c8_21 = arith.constant 8 : index
    %17 = vector.load %arg7[%c1_20, %c8_21] : memref<18x72xbf16, #tpu.memory_space<vmem>>, vector<16x64xbf16>
    %c2 = arith.constant 2 : index
    %c0_22 = arith.constant 0 : index
    %18 = vector.load %arg7[%c2, %c0_22] : memref<18x72xbf16, #tpu.memory_space<vmem>>, vector<16x64xbf16>
    %c2_23 = arith.constant 2 : index
    %c4_24 = arith.constant 4 : index
    %19 = vector.load %arg7[%c2_23, %c4_24] : memref<18x72xbf16, #tpu.memory_space<vmem>>, vector<16x64xbf16>
    %c2_25 = arith.constant 2 : index
    %c8_26 = arith.constant 8 : index
    %20 = vector.load %arg7[%c2_25, %c8_26] : memref<18x72xbf16, #tpu.memory_space<vmem>>, vector<16x64xbf16>
    %21 = tpu.concatenate %12, %13, %14, %15, %16, %17, %18, %19, %20 in 1 : vector<16x64xbf16>, vector<16x64xbf16>, vector<16x64xbf16>, vector<16x64xbf16>, vector<16x64xbf16>, vector<16x64xbf16>, vector<16x64xbf16>, vector<16x64xbf16>, vector<16x64xbf16> -> vector<16x576xbf16>
    %c0_27 = arith.constant 0 : index
    %c0_28 = arith.constant 0 : index
    %22 = vector.load %arg2[%c0_27, %c0_28] : memref<576x64xbf16, #tpu.memory_space<vmem>>, vector<576x64xbf16>
    %cst_29 = arith.constant dense<0.000000e+00> : vector<16x64xf32>
    %23 = tpu.matmul %21, %22, %cst_29 {dimension_numbers = #tpu.dot_dimension_numbers<[1], [0], [0], [1], [0, 0, 1, 1], [], []>} : vector<16x576xbf16>, vector<576x64xbf16>, vector<16x64xf32> -> vector<16x64xf32>
    %c0_30 = arith.constant 0 : index
    %c0_31 = arith.constant 0 : index
    %24 = vector.load %arg3[%c0_30, %c0_31] : memref<1x64xf32, #tpu.memory_space<vmem>>, vector<1x64xf32>
    %25 = vector.broadcast %24 : vector<1x64xf32> to vector<16x64xf32>
    %26 = arith.addf %23, %25 : vector<16x64xf32>
    %cst_32 = arith.constant 0.000000e+00 : f32
    %27 = vector.broadcast %cst_32 : f32 to vector<16x64xf32>
    %28 = arith.maximumf %26, %27 : vector<16x64xf32>
    %cst_33 = arith.constant 0.000000e+00 : bf16
    %29 = vector.broadcast %cst_33 : bf16 to vector<1x72xbf16>
    %c0_34 = arith.constant 0 : index
    %c0_35 = arith.constant 0 : index
    %30 = vector.load %arg8[%c0_34, %c0_35] : memref<18x72xbf16, #tpu.memory_space<vmem>>, vector<1x72xbf16>
    tpu.vector_store %arg8[%c0_34, %c0_35], %29 {strides = array<i32>} : memref<18x72xbf16, #tpu.memory_space<vmem>>, vector<1x72xbf16>,
    %cst_36 = arith.constant 0.000000e+00 : bf16
    %31 = vector.broadcast %cst_36 : bf16 to vector<1x72xbf16>
    %c17_37 = arith.constant 17 : index
    %c0_38 = arith.constant 0 : index
    %32 = vector.load %arg8[%c17_37, %c0_38] : memref<18x72xbf16, #tpu.memory_space<vmem>>, vector<1x72xbf16>
    tpu.vector_store %arg8[%c17_37, %c0_38], %31 {strides = array<i32>} : memref<18x72xbf16, #tpu.memory_space<vmem>>, vector<1x72xbf16>,
    %cst_39 = arith.constant 0.000000e+00 : bf16
    %33 = vector.broadcast %cst_39 : bf16 to vector<18x4xbf16>
    %c0_40 = arith.constant 0 : index
    %c0_41 = arith.constant 0 : index
    %34 = vector.load %arg8[%c0_40, %c0_41] : memref<18x72xbf16, #tpu.memory_space<vmem>>, vector<18x4xbf16>
    tpu.vector_store %arg8[%c0_40, %c0_41], %33 {strides = array<i32>} : memref<18x72xbf16, #tpu.memory_space<vmem>>, vector<18x4xbf16>,
    %cst_42 = arith.constant 0.000000e+00 : bf16
    %35 = vector.broadcast %cst_42 : bf16 to vector<18x4xbf16>
    %c0_43 = arith.constant 0 : index
    %c68_44 = arith.constant 68 : index
    %36 = vector.load %arg8[%c0_43, %c68_44] : memref<18x72xbf16, #tpu.memory_space<vmem>>, vector<18x4xbf16>
    tpu.vector_store %arg8[%c0_43, %c68_44], %35 {strides = array<i32>} : memref<18x72xbf16, #tpu.memory_space<vmem>>, vector<18x4xbf16>,
    %37 = arith.truncf %28 : vector<16x64xf32> to vector<16x64xbf16>
    %c1_45 = arith.constant 1 : index
    %c4_46 = arith.constant 4 : index
    %38 = vector.load %arg8[%c1_45, %c4_46] : memref<18x72xbf16, #tpu.memory_space<vmem>>, vector<16x64xbf16>
    tpu.vector_store %arg8[%c1_45, %c4_46], %37 {strides = array<i32>} : memref<18x72xbf16, #tpu.memory_space<vmem>>, vector<16x64xbf16>,
    %c0_47 = arith.constant 0 : index
    %c0_48 = arith.constant 0 : index
    %39 = vector.load %arg8[%c0_47, %c0_48] : memref<18x72xbf16, #tpu.memory_space<vmem>>, vector<16x64xbf16>
    %c0_49 = arith.constant 0 : index
    %c4_50 = arith.constant 4 : index
    %40 = vector.load %arg8[%c0_49, %c4_50] : memref<18x72xbf16, #tpu.memory_space<vmem>>, vector<16x64xbf16>
    %c0_51 = arith.constant 0 : index
    %c8_52 = arith.constant 8 : index
    %41 = vector.load %arg8[%c0_51, %c8_52] : memref<18x72xbf16, #tpu.memory_space<vmem>>, vector<16x64xbf16>
    %c1_53 = arith.constant 1 : index
    %c0_54 = arith.constant 0 : index
    %42 = vector.load %arg8[%c1_53, %c0_54] : memref<18x72xbf16, #tpu.memory_space<vmem>>, vector<16x64xbf16>
    %c1_55 = arith.constant 1 : index
    %c4_56 = arith.constant 4 : index
    %43 = vector.load %arg8[%c1_55, %c4_56] : memref<18x72xbf16, #tpu.memory_space<vmem>>, vector<16x64xbf16>
    %c1_57 = arith.constant 1 : index
    %c8_58 = arith.constant 8 : index
    %44 = vector.load %arg8[%c1_57, %c8_58] : memref<18x72xbf16, #tpu.memory_space<vmem>>, vector<16x64xbf16>
    %c2_59 = arith.constant 2 : index
    %c0_60 = arith.constant 0 : index
    %45 = vector.load %arg8[%c2_59, %c0_60] : memref<18x72xbf16, #tpu.memory_space<vmem>>, vector<16x64xbf16>
    %c2_61 = arith.constant 2 : index
    %c4_62 = arith.constant 4 : index
    %46 = vector.load %arg8[%c2_61, %c4_62] : memref<18x72xbf16, #tpu.memory_space<vmem>>, vector<16x64xbf16>
    %c2_63 = arith.constant 2 : index
    %c8_64 = arith.constant 8 : index
    %47 = vector.load %arg8[%c2_63, %c8_64] : memref<18x72xbf16, #tpu.memory_space<vmem>>, vector<16x64xbf16>
    %48 = tpu.concatenate %39, %40, %41, %42, %43, %44, %45, %46, %47 in 1 : vector<16x64xbf16>, vector<16x64xbf16>, vector<16x64xbf16>, vector<16x64xbf16>, vector<16x64xbf16>, vector<16x64xbf16>, vector<16x64xbf16>, vector<16x64xbf16>, vector<16x64xbf16> -> vector<16x576xbf16>
    %c0_65 = arith.constant 0 : index
    %c0_66 = arith.constant 0 : index
    %49 = vector.load %arg4[%c0_65, %c0_66] : memref<576x64xbf16, #tpu.memory_space<vmem>>, vector<576x64xbf16>
    %cst_67 = arith.constant dense<0.000000e+00> : vector<16x64xf32>
    %50 = tpu.matmul %48, %49, %cst_67 {dimension_numbers = #tpu.dot_dimension_numbers<[1], [0], [0], [1], [0, 0, 1, 1], [], []>} : vector<16x576xbf16>, vector<576x64xbf16>, vector<16x64xf32> -> vector<16x64xf32>
    %c0_68 = arith.constant 0 : index
    %c0_69 = arith.constant 0 : index
    %51 = vector.load %arg5[%c0_68, %c0_69] : memref<1x64xf32, #tpu.memory_space<vmem>>, vector<1x64xf32>
    %52 = vector.broadcast %51 : vector<1x64xf32> to vector<16x64xf32>
    %53 = arith.addf %50, %52 : vector<16x64xf32>
    %54 = arith.addf %53, %1 : vector<16x64xf32>
    %cst_70 = arith.constant 0.000000e+00 : f32
    %55 = vector.broadcast %cst_70 : f32 to vector<16x64xf32>
    %56 = arith.maximumf %54, %55 : vector<16x64xf32>
    %c0_71 = arith.constant 0 : index
    %c0_72 = arith.constant 0 : index
    %c0_73 = arith.constant 0 : index
    %57 = vector.load %arg6[%c0_71, %c0_72, %c0_73] : memref<1x16x64xf32, #tpu.memory_space<vmem>>, vector<1x16x64xf32>
    %58 = vector.shape_cast %57 : vector<1x16x64xf32> to vector<16x64xf32>
    %59 = vector.shape_cast %56 : vector<16x64xf32> to vector<1x16x64xf32>
    tpu.vector_store %arg6[%c0_71, %c0_72, %c0_73], %59 {strides = array<i32>} : memref<1x16x64xf32, #tpu.memory_space<vmem>>, vector<1x16x64xf32>,
    return
  }
  func.func @transform_0(%arg0: i32) -> (i32, i32, i32) {
    %c0_i32 = arith.constant 0 : i32
    %c0_i32_0 = arith.constant 0 : i32
    %c0_i32_1 = arith.constant 0 : i32
    return %arg0, %c0_i32, %c0_i32_0 : i32, i32, i32
  }
  func.func @transform_1(%arg0: i32) -> (i32, i32) {
    %c0_i32 = arith.constant 0 : i32
    %c0_i32_0 = arith.constant 0 : i32
    %c0_i32_1 = arith.constant 0 : i32
    return %c0_i32, %c0_i32_0 : i32, i32
  }
  func.func @transform_2(%arg0: i32) -> (i32, i32) {
    %c0_i32 = arith.constant 0 : i32
    %c0_i32_0 = arith.constant 0 : i32
    %c0_i32_1 = arith.constant 0 : i32
    return %c0_i32, %c0_i32_0 : i32, i32
  }
  func.func @transform_3(%arg0: i32) -> (i32, i32) {
    %c0_i32 = arith.constant 0 : i32
    %c0_i32_0 = arith.constant 0 : i32
    %c0_i32_1 = arith.constant 0 : i32
    return %c0_i32, %c0_i32_0 : i32, i32
  }
  func.func @transform_4(%arg0: i32) -> (i32, i32) {
    %c0_i32 = arith.constant 0 : i32
    %c0_i32_0 = arith.constant 0 : i32
    %c0_i32_1 = arith.constant 0 : i32
    return %c0_i32, %c0_i32_0 : i32, i32
  }
  func.func @transform_5(%arg0: i32) -> (i32, i32, i32) {
    %c0_i32 = arith.constant 0 : i32
    %c0_i32_0 = arith.constant 0 : i32
    %c0_i32_1 = arith.constant 0 : i32
    return %arg0, %c0_i32, %c0_i32_0 : i32, i32, i32
  }
}

</mosaic_0001>

<bundles_post_ra>
// kernel: tpu_custom_call.1
= control target key start
LH: loop header
LB: loop body
LE: loop exit
PB: predicated region body
PF: predicated region fallthrough
CT: control target
= control target key end

     0   :  { %10 = vsyncpa [#allocation5], 0  ;;  %s2292_s0 = inlined_call_operand.vmem [shape: f32[2,16,64], index: 0, kind: input, shape index: {}]   ;;  %s2293_s1 = inlined_call_operand.vmem [shape: bf16[576,64], index: 1, kind: input, shape index: {}]   ;;  %s2294_s2 = inlined_call_operand.vmem [shape: f32[1,64], index: 2, kind: input, shape index: {}]   ;;  %s2295_s3 = inlined_call_operand.vmem [shape: bf16[576,64], index: 3, kind: input, shape index: {}]   ;;  %s2296_s4 = inlined_call_operand.vmem [shape: f32[1,64], index: 4, kind: input, shape index: {}]   ;;  %s2297_s5 = inlined_call_operand.hbm [shape: f32[2,16,64], index: 5, kind: output, shape index: {}]  }
   0x1   :  { %12 = vsyncpa [#allocation5 + $0x1], 0  ;;  %s1849_s18 = smov 0   ;;  %s1851_s19 = smov 0  }
   0x2   :  { %s1853_s20 = smov 0   ;;  %s1855_s21 = smov 0  }
   0x3 LB: > { %s1870_s22 = sadd.s32 4294967295, %s1805_s21   ;;  %s1391_s23 = sadd.s32 4294967294, %s1805_s21   ;;  %s1805_s21 = sphi %s1855_s21, %s2313_s21   ;;  %s1801_s20 = sphi %s1853_s20, %s2312_s20   ;;  %s1797_s19 = sphi %s1851_s19, %s2311_s19   ;;  %s1793_s18 = sphi %s1849_s18, %s2310_s18  }
   0x4   : > { %s1874_s24 = sadd.s32 1, %s1805_s21   ;;  %s135_s25 = sadd.s32 1, %s1801_s20 }
   0x5   : > { %s132_s26 = ssub.s32 %s1805_s21, %s1874_s24  ;;  %p145_p0 = scmp.ne.s32.totalorder %s1801_s20, %s1797_s19 }
   0x6   : > { %p133_p1 = scmp.eq.s32.totalorder %s132_s26, 0  ;;  %p146_p2 = scmp.eq.s32.totalorder %s1870_s22, 1 }
   0x7   : > { %p151_p3 = scmp.ne.s32.totalorder %s1797_s19, %s1793_s18  ;;  %p152_p4 = scmp.eq.s32.totalorder %s1391_s23, 1 }
   0x8   : > { %s1885_s27 = scalar_select %p133_p1, %s1801_s20, %s135_s25  }
   0x9   : > { %p1887_p5 = por %p146_p2, %p145_p0  ;;  %p1891_p6 = por %p152_p4, %p151_p3 }
   0xa   : > { %p1394_p7 = scmp.ge.s32.totalorder %s1805_s21, 1  ;;  %p190_p8 = scmp.lt.s32.totalorder %s1805_s21, 3 }
   0xc   : > { %p191_p9 = pnand %p1394_p7, %p190_p8 }
   0xd   : > { %p218_p10 = scmp.lt.s32.totalorder (!%p191_p9), %s1870_s22, 1  ;;  %s1808_s10 = smov (!%p191_p9), 4  }
   0xe   : > { %194 = sbr.rel (%p191_p9) target bundleno = 994 (0x3e2), region = 40  ;;  %s1810_s15 = smov (!%p191_p9), 120  }
   0xf   : > { %s1811_s16 = smov (!%p191_p9), 60   ;;  %s1812_s17 = smov (!%p191_p9), 64  }
  0x10   : > { %s1813_s23 = smov (!%p191_p9), 124   ;;  %s1814_s25 = smov (!%p191_p9), 56  }
  0x11   : > { %s215_s7 = sand.u32 (!%p191_p9), 1, %s1797_s19  }
  0x12   : > { %s1395_s8 = sshll.u32 (!%p191_p9), %s215_s7, 4 }
  0x13   : > { %vm227_vm0 = vsmask.f32 256  ;;  %vm226_vm1 = vcmask 581632   ;;  %v229_v0 = vld [vmem:[#allocation2] sm:$0x1]  ;;  %s219_s30 = scalar_select %p218_p10, %s1870_s22, 1 }
  0x14   : > { %vm232_vm2 = vsmask.f32 7938  ;;  %vm1900_vm3 = vmand %vm226_vm1, %vm227_vm0  ;;  %v234_v2 = vld [vmem:[#allocation2 + $0x8] sm:$0x1]  ;;  %vm237_vm4 = vcmask 27648   ;;  %vm240_vm5 = vcmask 24576  }
  0x15   : > { %v230_v3 = vsel %vm1900_vm3, 0, %v229_v0  ;;  %vm1907_vm6 = vmand %vm226_vm1, %vm232_vm2  ;;  %vm242_vm7 = vcmask 585248   ;;  %v778_v5 = vld [vmem:[#allocation3] sm:$0x1]  ;;  %v781_v6 = vld [vmem:[#allocation3 + $0x8] sm:$0x1] }
  0x16   : > { %v1807_v7 = vmov 0   ;;  %s1489_s6 = sshll.u32 %s219_s30, 4  ;;  %231 = vst [vmem:[#allocation2] sm:$0x1] %v230_v3  ;;  %v235_v8 = vsel %vm1907_vm6, 0, %v234_v2  ;;  %v779_v9 = vsel %vm1900_vm3, 0, %v778_v5 }
  0x17   : > { %239 = vst.msk [vmem:[#allocation2 + $0x4] sm:$0xf] %vm237_vm4, %v1807_v7  ;;  %785 = vst.msk [vmem:[#allocation3 + $0x4] sm:$0xf] %vm237_vm4, %v1807_v7  ;;  %v782_v10 = vsel %vm1907_vm6, 0, %v781_v6  ;;  %vm245_vm8 = vcmask 582176   ;;  %s222_s9 = scalar_lea.vmem %s2292_s0, %s1489_s6 }
  0x18   : > { %244 = vst.msk [vmem:[#allocation2 + $0x4] sm:$0xf] %vm242_vm7, %v1807_v7  ;;  %788 = vst.msk [vmem:[#allocation3 + $0x4] sm:$0xf] %vm242_vm7, %v1807_v7  ;;  %v1925_v11 = vld [vmem:[%s222_s9] sm:$0xff]  ;;  %v1927_v12 = vld [vmem:[%s222_s9 + $0x8] sm:$0xff] }
  0x19   : > { %236 = vst [vmem:[#allocation2 + $0x8] sm:$0x1] %v235_v8  ;;  %238 = vst.msk [vmem:[#allocation2] sm:$0xf] %vm237_vm4, %v1807_v7  ;;  %vm253_vm9 = vsmask.f32 4368  ;;  %v1490_v13 = vpack.c.bf16 %v1925_v11, %v1925_v11  ;;  %v1491_v14 = vpack.c.bf16 %v1927_v12, %v1927_v12 }
  0x1a   : > { %780 = vst [vmem:[#allocation3] sm:$0x1] %v779_v9  ;;  %783 = vst [vmem:[#allocation3 + $0x8] sm:$0x1] %v782_v10  ;;  %v1670_v27 = vld [vmem:[%s2293_s1 + $0x78] sm:$0xff]   ;;  %v1672_v29 = vld [vmem:[%s2293_s1 + $0x70] sm:$0xff]  }
  0x1b   : > { %241 = vst.msk [vmem:[#allocation2 + $0x8] sm:$0x1] %vm240_vm5, %v1807_v7  ;;  %786 = vst.msk [vmem:[#allocation3 + $0x8] sm:$0x1] %vm240_vm5, %v1807_v7  ;;  %v256_v15 = vshrl.u32 %v1490_v13, 16  ;;  %v259_v16 = vshll.u32 %v1490_v13, 16  ;;  %1495 = vmatprep.subr.bf16.mxu0 %v1670_v27 }
  0x1c   : > { %243 = vst.msk [vmem:[#allocation2] sm:$0xf] %vm242_vm7, %v1807_v7  ;;  %v264_v17 = vshrl.u32 %v1491_v14, 16  ;;  %v267_v18 = vshll.u32 %v1491_v14, 16  ;;  %vm1942_vm10 = vmor %vm227_vm0, %vm253_vm9  ;;  %v1671_v28 = vld [vmem:[%s2293_s1 + $0x38] sm:$0xff]   ;;  %v1673_v32 = vld [vmem:[%s2293_s1 + $0x30] sm:$0xff]  }
  0x1d   : > { %784 = vst.msk [vmem:[#allocation3] sm:$0xf] %vm237_vm4, %v1807_v7  ;;  %v258_v19 = vrot.slane %v256_v15, 7  ;;  %v1675_v30 = vld [vmem:[%s2293_s1 + $0xf8] sm:$0xff]   ;;  %1496 = vmatpush3.bf16.msra.mxu0 %v1671_v28  ;;  %v1679_v33 = vld [vmem:[%s2293_s1 + $0xf0] sm:$0xff]   ;;  %v1674_v34 = vld [vmem:[%s2293_s1 + $0x68] sm:$0xff]  }
  0x1e   : > { %246 = vst.msk [vmem:[#allocation2 + $0x8] sm:$0x1] %vm245_vm8, %v1807_v7  ;;  %789 = vst.msk [vmem:[#allocation3 + $0x8] sm:$0x1] %vm245_vm8, %v1807_v7  ;;  %v266_v20 = vrot.slane %v264_v17, 7  ;;  %v1677_v31 = vld [vmem:[%s2293_s1 + $0xb8] sm:$0xff]   ;;  %1517 = vmatprep.subr.bf16.mxu1 %v1675_v30  ;;  %1497 = vmatprep.subr.bf16.mxu0 %v1672_v29 }
  0x1f   : > { %787 = vst.msk [vmem:[#allocation3] sm:$0xf] %vm242_vm7, %v1807_v7  ;;  %v261_v21 = vor.u32 %v259_v16, %v258_v19  ;;  %v262_v22 = vrot.slane %v258_v19, 4  ;;  %1518 = vmatpush3.bf16.msra.mxu1 %v1677_v31  ;;  %v1681_v35 = vld [vmem:[%s2293_s1 + $0xb0] sm:$0xff]   ;;  %v1676_v36 = vld [vmem:[%s2293_s1 + $0x28] sm:$0xff]   ;;  %v1678_v38 = vld [vmem:[%s2293_s1 + $0x60] sm:$0xff]  }
  0x20   : > { %v271_v23 = vrot.slane %v266_v20, 4  ;;  %v269_v24 = vor.u32 %v267_v18, %v266_v20  ;;  %1519 = vmatprep.subr.bf16.mxu1 %v1679_v33  ;;  %v1683_v37 = vld [vmem:[%s2293_s1 + $0xe8] sm:$0xff]   ;;  %v1687_v40 = vld [vmem:[%s2293_s1 + $0xe0] sm:$0xff]   ;;  %v1682_v42 = vld [vmem:[%s2293_s1 + $0x58] sm:$0xff]   ;;  %vm281_vm11 = vcmask 551968   ;;  %vm288_vm12 = vcmask 548896  }
  0x21   : > { %272 = vrot.lane.b32.xlu0 %v261_v21, %s1808_s10  ;;  %v1685_v39 = vld [vmem:[%s2293_s1 + $0xa8] sm:$0xff]   ;;  %1498 = vmatpush3.bf16.msra.mxu0 %v1673_v32  ;;  %v1680_v41 = vld [vmem:[%s2293_s1 + $0x20] sm:$0xff]   ;;  %v1684_v44 = vld [vmem:[%s2293_s1 + $0x18] sm:$0xff]   ;;  %v1809_v3 = vmov 0.0   ;;  %vm309_vm15 = vsmask.f32 7424 }
  0x22   : > { %276 = vrot.lane.b32.xlu1 %v271_v23, %s1808_s10  ;;  %v270_v26 = vsel %vm1942_vm10, %v262_v22, %v269_v24  ;;  %1499 = vmatprep.subr.bf16.mxu0 %v1674_v34  ;;  %v1689_v43 = vld [vmem:[%s2293_s1 + $0xa0] sm:$0xff]   ;;  %v1686_v45 = vld [vmem:[%s2293_s1 + $0x50] sm:$0xff]   ;;  %vm2013_vm13 = vmand %vm281_vm11, %vm232_vm2  ;;  %vm339_vm1 = vcmask 523264   ;;  %vm1815_vm2 = vmmov 0   ;;  %s1494_s9 = sshll.u32 %s1870_s22, 8  ;;  %s217_s11 = scalar_lea.vmem [#allocation4], %s1395_s8 }
  0x23   : > { %1520 = vmatpush3.bf16.msra.mxu1 %v1681_v35  ;;  %v1688_v46 = vld [vmem:[%s2293_s1 + $0x10] sm:$0xff]   ;;  %v283_v48 = vld [vmem:[#allocation2] sm:$0xf]  ;;  %vm2018_vm14 = vmand %vm288_vm12, %vm227_vm0  ;;  %vm331_vm0 = vcmask 1046528   ;;  %s1329_s12 = sshll.u32 %s217_s11, 4  ;;  %s2252_s22 = scalar_lea.sflag [#allocation5], %s215_s7  ;;  %s2249_s12 = int_to_ptr.vmem [resolvable:$true] %s1329_s12 }
  0x24   : > { %1521 = vmatprep.subr.bf16.mxu1 %v1683_v37  ;;  %v1690_v53 = vld [vmem:[%s2293_s1 + $0x48] sm:$0xff]   ;;  %v1691_v54 = vld [vmem:[%s2293_s1 + $0xd8] sm:$0xff]   ;;  %v1694_v60 = vld [vmem:[%s2293_s1 + $0x40] sm:$0xff]  }
  0x25   : > { %274 = vrot.lane.b32.xlu0 %v270_v26, %s1808_s10  ;;  %1500 = vmatpush3.bf16.msra.mxu0 %v1676_v36  ;;  %v290_v50 = vld [vmem:[#allocation2 + $0x8] sm:$0x1]  ;;  %v1693_v58 = vld [vmem:[%s2293_s1 + $0x98] sm:$0xff]   ;;  %v1695_v61 = vld [vmem:[%s2293_s1 + $0xd0] sm:$0xff]  }
  0x26   : > { %1501 = vmatprep.subr.bf16.mxu0 %v1678_v38  ;;  %v1692_v57 = vld [vmem:[%s2293_s1 + $0x8] sm:$0xff]   ;;  %v1696_v62 = vld [vmem:[%s2293_s1] sm:$0xff]   ;;  %v1697_v63 = vld [vmem:[%s2293_s1 + $0x90] sm:$0xff]  }
  0x27   : > { %1522 = vmatpush3.bf16.msra.mxu1 %v1685_v39  ;;  %v1698_v0 = vld [vmem:[%s2293_s1 + $0xc8] sm:$0xff]   ;;  %v1701_v8 = vld [vmem:[%s2293_s1 + $0xc0] sm:$0xff]   ;;  %v1700_v27 = vld [vmem:[%s2293_s1 + $0x118] sm:$0xff]  }
  0x28   : > { %1523 = vmatprep.subr.bf16.mxu1 %v1687_v40  ;;  %v1699_v1 = vld [vmem:[%s2293_s1 + $0x88] sm:$0xff]   ;;  %v1702_v9 = vld [vmem:[%s2293_s1 + $0x80] sm:$0xff]   ;;  %v1703_v31 = vld [vmem:[%s2293_s1 + $0x110] sm:$0xff]  }
  0x29   : > { %1502 = vmatpush3.bf16.msra.mxu0 %v1680_v41  ;;  %v1704_v35 = vld [vmem:[%s2293_s1 + $0x108] sm:$0xff]   ;;  %v1705_v37 = vld [vmem:[%s2293_s1 + $0x100] sm:$0xff]   ;;  %v1716_v25 = vld [vmem:[%s2295_s3 + $0xb8] sm:$0xff]  }
  0x2a   : > { %1503 = vmatprep.subr.bf16.mxu0 %v1682_v42  ;;  %v1736_v49 = vld [vmem:[%s2295_s3 + $0x90] sm:$0xff]  }
  0x2b   : > { %1524 = vmatpush3.bf16.msra.mxu1 %v1689_v43 }
  0x2c   : > { %1525 = vmatprep.subr.bf16.mxu1 %v1691_v54 }
  0x2d   : > { %1504 = vmatpush3.bf16.msra.mxu0 %v1684_v44 }
  0x2e   : > { %1505 = vmatprep.subr.bf16.mxu0 %v1686_v45  ;;  %v1403_v45 = vld [vmem:[%s2294_s2] ss:$0 sm:$0xff] }
  0x2f   : > { %1526 = vmatpush3.bf16.msra.mxu1 %v1693_v58 }
  0x30   : > { %1527 = vmatprep.subr.bf16.mxu1 %v1695_v61 }
  0x31   : > { %1506 = vmatpush3.bf16.msra.mxu0 %v1688_v46 }
  0x32   : > { %1507 = vmatprep.subr.bf16.mxu0 %v1690_v53 }
  0x33   : > { %1528 = vmatpush3.bf16.msra.mxu1 %v1697_v63 }
  0x34   : > { %1529 = vmatprep.subr.bf16.mxu1 %v1698_v0 }
  0x35   : > { %1508 = vmatpush3.bf16.msra.mxu0 %v1692_v57 }
  0x36   : > { %1509 = vmatprep.subr.bf16.mxu0 %v1694_v60 }
  0x37   : > { %1530 = vmatpush3.bf16.msra.mxu1 %v1699_v1 }
  0x38   : > { %1531 = vmatprep.subr.bf16.mxu1 %v1701_v8 }
  0x39   : > { %1510 = vmatpush3.bf16.msra.mxu0 %v1696_v62 }
  0x3a   : > { %1593 = vmatprep.subr.bf16.mxu0 %v1809_v3 }
  0x3b   : > { %1532 = vmatpush3.bf16.msra.mxu1 %v1702_v9 }
  0x93   : > { %v273_v51 = vpop.permute.xlu0 %272 }
  0x94   : > { %v277_v52 = vpop.permute.xlu1 %276  ;;  %v284_v55 = vsel %vm2013_vm13, %v273_v51, %v283_v48 }
  0x95   : > { %v291_v56 = vsel %vm2018_vm14, %v277_v52, %v290_v50  ;;  %285 = vst [vmem:[#allocation2] sm:$0xf] %v284_v55 }
  0x96   : > { %292 = vst [vmem:[#allocation2 + $0x8] sm:$0x1] %v291_v56 }
  0x97   : > { %v275_v59 = vpop.permute.xlu0 %274 }
  0x98   : > { %287 = vst.msk [vmem:[#allocation2 + $0x4] sm:$0xf] %vm281_vm11, %v275_v59 }
  0x9c   : > { %v293_v4 = vld [vmem:[#allocation2] sm:$0xf] }
  0x9d   : > { %v1668_v2 = vld [vmem:[#allocation2 + $0x8] ss:$0 sps:$4 sm:$0x11]   ;;  %v296_v13 = vld [vmem:[#allocation2] sm:$0xe] }
  0x9e   : > { %v318_v7 = vshll.u32 %v1668_v2, 16  ;;  %v333_v21 = vrot.slane %v1668_v2, 1 }
  0x9f   : > { %v294_v5 = vld [vmem:[#allocation2 + $0x4] sm:$0xf] }
  0xa0   : > { %v1400_v6 = vcombine.low %v293_v4, %v294_v5  ;;  %v320_v16 = vrot.slane %v318_v7, 1  ;;  %v1402_v17 = vcombine.low %v296_v13, %v294_v5 }
  0xa2   : > { %304 = vrot.lane.b32.xlu1 %v1400_v6, %s1810_s15  ;;  %v313_v10 = vshll.u32 %v1400_v6, 16  ;;  %v311_v14 = vshrl.u32 %v1400_v6, 16  ;;  %v332_v20 = vrot.slane %v1402_v17, 1 }
  0xa4   : > { %v315_v15 = vrot.slane %v313_v10, 1  ;;  %v334_v22 = vsel %vm331_vm0, %v332_v20, %v333_v21  ;;  %v1711_v20 = vld [vmem:[%s2295_s3 + $0x70] sm:$0xff]   ;;  %v1714_v21 = vld [vmem:[%s2295_s3 + $0xf8] sm:$0xff]  }
  0xa6   : > { %302 = vrot.lane.b32.xlu1 %v1400_v6, %s1811_s16  ;;  %v316_v18 = vor.u32 %v315_v15, %v311_v14 }
  0xa8   : > { %v321_v19 = vsel %vm309_vm15, %v316_v18, %v320_v16  ;;  %v1709_v18 = vld [vmem:[%s2295_s3 + $0x78] sm:$0xff]  }
  0xa9   : > { %322 = vrot.lane.b32.xlu0 %v321_v19, %s1812_s17  ;;  %1544 = vmatprep.subr.bf16.mxu1 %v1709_v18 }
  0xaa   : > { %324 = vrot.lane.b32.xlu1 %v321_v19, %s1813_s23 }
  0xad   : > { %335 = vrot.lane.b32.xlu0 %v334_v22, %s1811_s16 }
  0xae   : > { %337 = vrot.lane.b32.xlu1 %v334_v22, %s1810_s15 }
  0xb1   : > { %326 = vrot.lane.b32.xlu0 %v321_v19, %s1814_s25  ;;  %v1710_v19 = vld [vmem:[%s2295_s3 + $0x38] sm:$0xff]  }
 0x114   : > { %v305_v23 = vpop.permute.xlu1 %304 }
 0x118   : > { %v303_v24 = vpop.permute.xlu1 %302 }
 0x119   : > { %v341_v29 = vsel %vm339_vm1, %v1400_v6, %v303_v24  ;;  %v1713_v24 = vld [vmem:[%s2295_s3 + $0x68] sm:$0xff]  }
 0x11b   : > { %v323_v26 = vpop.permute.xlu0 %322 }
 0x11c   : > { %v345_v28 = vsel %vm339_vm1, %v305_v23, %v323_v26  ;;  %v325_v33 = vpop.permute.xlu1 %324  ;;  %v1718_v23 = vld [vmem:[%s2295_s3 + $0xf0] sm:$0xff]  }
 0x11d   : > { %685 = vmatprep.mubr.bf16.mxu0 %v345_v28  ;;  %v1720_v26 = vld [vmem:[%s2295_s3 + $0xb0] sm:$0xff]   ;;  %v1715_v28 = vld [vmem:[%s2295_s3 + $0x28] sm:$0xff]  }
 0x11e   : > { %686 = vmatmul.mubr.bf16.vlgmr.msra.gmra.mxu0 %v341_v29  ;;  %v1717_v29 = vld [vmem:[%s2295_s3 + $0x60] sm:$0xff]  }
 0x11f   : > { %1594 = vmatpush3.bf16.msra.mxu0 %v1700_v27  ;;  %v336_v30 = vpop.permute.xlu0 %335  ;;  %1601 = vmatprep.mubr.msk.bf16.mxu0 %vm1815_vm2, %v1809_v3  ;;  %v1722_v27 = vld [vmem:[%s2295_s3 + $0xe8] sm:$0xff]  }
 0x120   : > { %v353_v32 = vsel %vm339_vm1, %v334_v22, %v336_v30  ;;  %1595 = vmatprep.subr.bf16.mxu0 %v1809_v3  ;;  %v338_v38 = vpop.permute.xlu1 %337  ;;  %v1712_v22 = vld [vmem:[%s2295_s3 + $0x30] sm:$0xff]   ;;  %v1724_v30 = vld [vmem:[%s2295_s3 + $0xa8] sm:$0xff]  }
 0x121   : > { %726 = vmatprep.mubr.bf16.mxu1 %v353_v32  ;;  %v1719_v32 = vld [vmem:[%s2295_s3 + $0x20] sm:$0xff]  }
 0x123   : > { %1596 = vmatpush3.bf16.msra.mxu0 %v1703_v31  ;;  %v327_v34 = vpop.permute.xlu0 %326  ;;  %v1726_v31 = vld [vmem:[%s2295_s3 + $0xe0] sm:$0xff]  }
 0x124   : > { %v349_v36 = vsel %vm339_vm1, %v325_v33, %v327_v34  ;;  %1597 = vmatprep.subr.bf16.mxu0 %v1809_v3  ;;  %v1721_v33 = vld [vmem:[%s2295_s3 + $0x58] sm:$0xff]   ;;  %v1728_v34 = vld [vmem:[%s2295_s3 + $0xa0] sm:$0xff]  }
 0x125   : > { %727 = vmatmul.mubr.bf16.vlgmr.msra.gmra.mxu1 %v349_v36  ;;  %v1725_v36 = vld [vmem:[%s2295_s3 + $0x50] sm:$0xff]  }
 0x126   : > { %1545 = vmatpush3.bf16.msra.mxu1 %v1710_v19  ;;  %v1742_v19 = vld [vmem:[%s2295_s3 + $0x110] sm:$0xff]  }
 0x127   : > { %1598 = vmatpush3.bf16.msra.mxu0 %v1704_v35  ;;  %1546 = vmatprep.subr.bf16.mxu1 %v1711_v20  ;;  %v1723_v35 = vld [vmem:[%s2295_s3 + $0x18] sm:$0xff]  }
 0x128   : > { %1599 = vmatprep.subr.bf16.mxu0 %v1809_v3 }
 0x12a   : > { %1547 = vmatpush3.bf16.msra.mxu1 %v1712_v22  ;;  %v1743_v22 = vld [vmem:[%s2295_s3 + $0x108] sm:$0xff]  }
 0x12b   : > { %1600 = vmatpush3.bf16.msra.mxu0 %v1705_v37  ;;  %1548 = vmatprep.subr.bf16.mxu1 %v1713_v24  ;;  %v1727_v37 = vld [vmem:[%s2295_s3 + $0x10] sm:$0xff]   ;;  %v1744_v24 = vld [vmem:[%s2295_s3 + $0x100] sm:$0xff]  }
 0x12c   : > { %1566 = vmatprep.subr.bf16.mxu0 %v1714_v21 }
 0x12e   : > { %1602 = vmatmul.mubr.msk.bf16.vlgmr.msra.gmra.mxu0 %vm339_vm1, %v338_v38  ;;  %1549 = vmatpush3.bf16.msra.mxu1 %v1715_v28  ;;  %v822_v38 = vld [vmem:[#allocation3] sm:$0xf] }
 0x12f   : > { %1567 = vmatpush3.bf16.msra.mxu0 %v1716_v25  ;;  %1550 = vmatprep.subr.bf16.mxu1 %v1717_v29 }
 0x130   : > { %1568 = vmatprep.subr.bf16.mxu0 %v1718_v23 }
 0x132   : > { %1551 = vmatpush3.bf16.msra.mxu1 %v1719_v32 }
 0x133   : > { %1569 = vmatpush3.bf16.msra.mxu0 %v1720_v26  ;;  %1552 = vmatprep.subr.bf16.mxu1 %v1721_v33  ;;  %v1446_v33 = vld [vmem:[%s2296_s4] ss:$0 sm:$0xff] }
 0x134   : > { %1570 = vmatprep.subr.bf16.mxu0 %v1722_v27 }
 0x136   : > { %1553 = vmatpush3.bf16.msra.mxu1 %v1723_v35 }
 0x137   : > { %1571 = vmatpush3.bf16.msra.mxu0 %v1724_v30  ;;  %1554 = vmatprep.subr.bf16.mxu1 %v1725_v36 }
 0x138   : > { %1572 = vmatprep.subr.bf16.mxu0 %v1726_v31 }
 0x13a   : > { %1555 = vmatpush3.bf16.msra.mxu1 %v1727_v37 }
 0x13b   : > { %1573 = vmatpush3.bf16.msra.mxu0 %v1728_v34 }
 0x1de   : > { %v1511_v39 = vpop.f32.mrf.mxu0 }
 0x1e0   : > { %v1512_v40 = vpop.f32.mrf.mxu0 }
 0x1e1   : > { %v1513_v43 = vadd.f32 %v1512_v40, %v1511_v39 }
 0x1e2   : > { %v1514_v41 = vpop.f32.mrf.mxu0 }
 0x1e3   : > { %v688_v51 = vadd.f32 %v1513_v43, %v1403_v45  ;;  %v1730_v43 = vld [vmem:[%s2295_s3 + $0xd8] sm:$0xff]  }
 0x1e4   : > { %v1515_v46 = vpop.f32.mrf.mxu0  ;;  %1574 = vmatprep.subr.bf16.mxu0 %v1730_v43 }
 0x1e5   : > { %v1533_v42 = vpop.f32.mrf.mxu1  ;;  %v1516_v52 = vadd.f32 %v1515_v46, %v1514_v41  ;;  %v826_v41 = vld [vmem:[#allocation3 + $0x8] sm:$0x1] }
 0x1e7   : > { %v1534_v44 = vpop.f32.mrf.mxu1  ;;  %v691_v57 = vadd.f32 %v1516_v52, %v1403_v45  ;;  %v1732_v45 = vld [vmem:[%s2295_s3 + $0x98] sm:$0xff]   ;;  %v1735_v52 = vld [vmem:[%s2295_s3] sm:$0xff]  }
 0x1e8   : > { %v1535_v48 = vadd.f32 %v1534_v44, %v1533_v42  ;;  %v1729_v42 = vld [vmem:[%s2295_s3 + $0x48] sm:$0xff]   ;;  %1575 = vmatpush3.bf16.msra.mxu0 %v1732_v45 }
 0x1e9   : > { %v1536_v50 = vpop.f32.mrf.mxu1  ;;  %v1731_v44 = vld [vmem:[%s2295_s3 + $0x8] sm:$0xff]   ;;  %1556 = vmatprep.subr.bf16.mxu1 %v1729_v42 }
 0x1ea   : > { %v729_v55 = vadd.f32 %v1535_v48, %v688_v51  ;;  %1557 = vmatpush3.bf16.msra.mxu1 %v1731_v44  ;;  %v1734_v51 = vld [vmem:[%s2295_s3 + $0xd0] sm:$0xff]  }
 0x1eb   : > { %v1537_v53 = vpop.f32.mrf.mxu1  ;;  %1576 = vmatprep.subr.bf16.mxu0 %v1734_v51 }
 0x1ec   : > { %v1538_v54 = vadd.f32 %v1537_v53, %v1536_v50  ;;  %v1733_v50 = vld [vmem:[%s2295_s3 + $0x40] sm:$0xff]   ;;  %1577 = vmatpush3.bf16.msra.mxu0 %v1736_v49  ;;  %v1737_v53 = vld [vmem:[%s2295_s3 + $0xc8] sm:$0xff]  }
 0x1ed   : > { %1558 = vmatprep.subr.bf16.mxu1 %v1733_v50  ;;  %1578 = vmatprep.subr.bf16.mxu0 %v1737_v53 }
 0x1ee   : > { %v769_v56 = vpop.f32.mrf.mxu0  ;;  %v732_v61 = vadd.f32 %v1538_v54, %v691_v57  ;;  %1559 = vmatpush3.bf16.msra.mxu1 %v1735_v52  ;;  %v1738_v54 = vld [vmem:[%s2295_s3 + $0x88] sm:$0xff]  }
 0x1ef   : > { %v770_v58 = vadd.f32 %v769_v56, %v729_v55  ;;  %1605 = vmatprep.subr.bf16.mxu1 %v1809_v3 }
 0x1f0   : > { %v1603_v59 = vpop.f32.mrf.mxu0  ;;  %1579 = vmatpush3.bf16.msra.mxu0 %v1738_v54 }
 0x1f1   : > { %v776_v60 = vmax.f32 %v770_v58, 0.0  ;;  %v1740_v59 = vld [vmem:[%s2295_s3 + $0xc0] sm:$0xff]  }
 0x1f2   : > { %v772_v62 = vpop.f32.mrf.mxu0  ;;  %1580 = vmatprep.subr.bf16.mxu0 %v1740_v59 }
 0x1f3   : > { %v1492_v63 = vpack.c.bf16 %v776_v60, %v776_v60  ;;  %v773_v0 = vadd.f32 %v772_v62, %v732_v61  ;;  %v1741_v60 = vld [vmem:[%s2295_s3 + $0x80] sm:$0xff]  }
 0x1f4   : > { %v1604_v1 = vpop.f32.mrf.mxu0  ;;  %1581 = vmatpush3.bf16.msra.mxu0 %v1741_v60 }
 0x1f5   : > { %v797_v2 = vshrl.u32 %v1492_v63, 16  ;;  %v777_v4 = vmax.f32 %v773_v0, 0.0  ;;  %v800_v6 = vshll.u32 %v1492_v63, 16 }
 0x1f7   : > { %v799_v5 = vrot.slane %v797_v2, 7  ;;  %v1493_v7 = vpack.c.bf16 %v777_v4, %v777_v4 }
 0x1f9   : > { %v805_v8 = vshrl.u32 %v1493_v7, 16  ;;  %v802_v9 = vor.u32 %v800_v6, %v799_v5  ;;  %v808_v13 = vshll.u32 %v1493_v7, 16  ;;  %v803_v14 = vrot.slane %v799_v5, 4 }
 0x1fb   : > { %v807_v10 = vrot.slane %v805_v8, 7  ;;  %813 = vrot.lane.b32.xlu0 %v802_v9, %s1808_s10 }
 0x1fd   : > { %v810_v15 = vor.u32 %v808_v13, %v807_v10  ;;  %v812_v16 = vrot.slane %v807_v10, 4 }
 0x1ff   : > { %817 = vrot.lane.b32.xlu0 %v812_v16, %s1808_s10  ;;  %v811_v17 = vsel %vm1942_vm10, %v803_v14, %v810_v15  ;;  %v1739_v15 = vld [vmem:[%s2295_s3 + $0x118] sm:$0xff]  }
 0x200   : > { %815 = vrot.lane.b32.xlu1 %v811_v17, %s1808_s10  ;;  %s2247_s10 = scalar_lea.hbm %s2297_s5, %s1494_s9 }
 0x26d   : > { %v814_v39 = vpop.permute.xlu0 %813 }
 0x26e   : > { %v823_v40 = vsel %vm2013_vm13, %v814_v39, %v822_v38 }
 0x26f   : > { %824 = vst [vmem:[#allocation3] sm:$0xf] %v823_v40 }
 0x271   : > { %v818_v47 = vpop.permute.xlu0 %817 }
 0x272   : > { %v827_v46 = vsel %vm2018_vm14, %v818_v47, %v826_v41  ;;  %v816_v48 = vpop.permute.xlu1 %815 }
 0x273   : > { %828 = vst [vmem:[#allocation3 + $0x8] sm:$0x1] %v827_v46  ;;  %825 = vst.msk [vmem:[#allocation3 + $0x4] sm:$0xf] %vm281_vm11, %v816_v48 }
 0x276   : > { %v829_v55 = vld [vmem:[#allocation3] sm:$0xf] }
 0x277   : > { %v832_v63 = vld [vmem:[#allocation3] sm:$0xe] }
 0x27a   : > { %v830_v56 = vld [vmem:[#allocation3 + $0x4] sm:$0xf]  ;;  %v1707_v58 = vld [vmem:[#allocation3 + $0x8] ss:$0 sps:$4 sm:$0x11]  }
 0x27b   : > { %v1443_v57 = vcombine.low %v829_v55, %v830_v56  ;;  %v853_v62 = vshll.u32 %v1707_v58, 16  ;;  %v1445_v2 = vcombine.low %v832_v63, %v830_v56  ;;  %v867_v8 = vrot.slane %v1707_v58, 1 }
 0x27d   : > { %840 = vrot.lane.b32.xlu1 %v1443_v57, %s1810_s15  ;;  %v848_v61 = vshll.u32 %v1443_v57, 16  ;;  %v846_v0 = vshrl.u32 %v1443_v57, 16  ;;  %v855_v5 = vrot.slane %v853_v62, 1  ;;  %v866_v7 = vrot.slane %v1445_v2, 1 }
 0x27f   : > { %v850_v1 = vrot.slane %v848_v61, 1  ;;  %v868_v9 = vsel %vm331_vm0, %v866_v7, %v867_v8 }
 0x281   : > { %838 = vrot.lane.b32.xlu1 %v1443_v57, %s1811_s16  ;;  %v851_v4 = vor.u32 %v850_v1, %v846_v0 }
 0x283   : > { %v856_v6 = vsel %vm309_vm15, %v851_v4, %v855_v5 }
 0x284   : > { %857 = vrot.lane.b32.xlu0 %v856_v6, %s1812_s17  ;;  %s1816_s17 = smov [#allocation4]  }
 0x285   : > { %859 = vrot.lane.b32.xlu1 %v856_v6, %s1813_s23 }
 0x288   : > { %869 = vrot.lane.b32.xlu0 %v868_v9, %s1811_s16  ;;  %s1745_s16 = scalar_lea.vmem %s2249_s12, 256 }
 0x289   : > { %871 = vrot.lane.b32.xlu1 %v868_v9, %s1810_s15  ;;  %p1746_p11 = scmp.ne.s32.totalorder %s2249_s12, %s1745_s16  ;;  %s1749_s15 = sshll.u32 %s1816_s17, 4  ;;  %s1750_s15 = int_to_ptr.vmem [resolvable:$false] %s1749_s15 }
 0x28a   : > { %s1751_s23 = scalar_lea.vmem %s1750_s15, 512  ;;  %p1752_p0 = scmp.lt.s32.totalorder %s2249_s12, %s1750_s15 }
 0x28b   : > { %p1747_p12 = pnand %p1746_p11, %p1887_p5  ;;  %p1753_p1 = scmp.lt.s32.totalorder %s1751_s23, %s1745_s16 }
 0x28c   : > { %861 = vrot.lane.b32.xlu0 %v856_v6, %s1814_s25 }
 0x28d   : > { %p1748_p13 = pneg %p1747_p12  ;;  %p1754_p2 = por %p1753_p1, %p1752_p0 }
 0x28f   : > { %p1755_p3 = pnand %p1754_p2, %p1748_p13 }
 0x2ef   : > { %v841_v10 = vpop.permute.xlu1 %840 }
 0x2f3   : > { %v839_v13 = vpop.permute.xlu1 %838 }
 0x2f4   : > { %v874_v17 = vsel %vm339_vm1, %v1443_v57, %v839_v13 }
 0x2f6   : > { %v858_v14 = vpop.permute.xlu0 %857 }
 0x2f7   : > { %v878_v16 = vsel %vm339_vm1, %v841_v10, %v858_v14  ;;  %v860_v21 = vpop.permute.xlu1 %859 }
 0x2f8   : > { %1218 = vmatprep.mubr.bf16.mxu1 %v878_v16 }
 0x2f9   : > { %1219 = vmatmul.mubr.bf16.vlgmr.msra.gmra.mxu1 %v874_v17 }
 0x2fa   : > { %1606 = vmatpush3.bf16.msra.mxu1 %v1739_v15  ;;  %v870_v18 = vpop.permute.xlu0 %869  ;;  %1613 = vmatprep.mubr.msk.bf16.mxu1 %vm1815_vm2, %v1809_v3 }
 0x2fb   : > { %v886_v20 = vsel %vm339_vm1, %v868_v9, %v870_v18  ;;  %1607 = vmatprep.subr.bf16.mxu1 %v1809_v3  ;;  %v872_v26 = vpop.permute.xlu1 %871 }
 0x2fc   : > { %1259 = vmatprep.mubr.bf16.mxu0 %v886_v20 }
 0x2fe   : > { %1608 = vmatpush3.bf16.msra.mxu1 %v1742_v19  ;;  %v862_v25 = vpop.permute.xlu0 %861 }
 0x2ff   : > { %v882_v23 = vsel %vm339_vm1, %v860_v21, %v862_v25  ;;  %1609 = vmatprep.subr.bf16.mxu1 %v1809_v3 }
 0x300   : > { %1260 = vmatmul.mubr.bf16.vlgmr.msra.gmra.mxu0 %v882_v23 }
 0x302   : > { %1610 = vmatpush3.bf16.msra.mxu1 %v1743_v22 }
 0x303   : > { %1611 = vmatprep.subr.bf16.mxu1 %v1809_v3 }
 0x306   : > { %1612 = vmatpush3.bf16.msra.mxu1 %v1744_v24 }
 0x309   : > { %1614 = vmatmul.mubr.msk.bf16.vlgmr.msra.gmra.mxu1 %vm339_vm1, %v872_v26 }
 0x3b9   : > { %v1560_v27 = vpop.f32.mrf.mxu1 }
 0x3bb   : > { %v1561_v28 = vpop.f32.mrf.mxu1 }
 0x3bc   : > { %v1562_v31 = vadd.f32 %v1561_v28, %v1560_v27 }
 0x3bd   : > { %v1563_v29 = vpop.f32.mrf.mxu1 }
 0x3be   : > { %v1221_v37 = vadd.f32 %v1562_v31, %v1446_v33 }
 0x3bf   : > { %v1564_v34 = vpop.f32.mrf.mxu1 }
 0x3c0   : > { %v1582_v30 = vpop.f32.mrf.mxu0  ;;  %v1565_v3 = vadd.f32 %v1564_v34, %v1563_v29 }
 0x3c2   : > { %v1583_v32 = vpop.f32.mrf.mxu0  ;;  %v1224_v42 = vadd.f32 %v1565_v3, %v1446_v33 }
 0x3c3   : > { %v1584_v35 = vadd.f32 %v1583_v32, %v1582_v30 }
 0x3c4   : > { %v1585_v36 = vpop.f32.mrf.mxu0 }
 0x3c5   : > { %v1262_v40 = vadd.f32 %v1584_v35, %v1221_v37 }
 0x3c6   : > { %v1586_v38 = vpop.f32.mrf.mxu0 }
 0x3c7   : > { %v1587_v39 = vadd.f32 %v1586_v38, %v1585_v36 }
 0x3c9   : > { %v1302_v41 = vpop.f32.mrf.mxu1  ;;  %v1265_v47 = vadd.f32 %v1587_v39, %v1224_v42 }
 0x3ca   : > { %v1303_v43 = vadd.f32 %v1302_v41, %v1262_v40 }
 0x3cb   : > { %v1615_v44 = vpop.f32.mrf.mxu1 }
 0x3cc   : > { %v1309_v45 = vadd.f32 %v1303_v43, %v1925_v11 }
 0x3cd   : > { %v1305_v46 = vpop.f32.mrf.mxu1 }
 0x3ce   : > { %v1311_v48 = vmax.f32 %v1309_v45, 0.0  ;;  %v1306_v50 = vadd.f32 %v1305_v46, %v1265_v47 }
 0x3cf   : > { %v1616_v51 = vpop.f32.mrf.mxu1 }
 0x3d0   : > { %1313 = vst.msk [vmem:[%s217_s11] sm:$0xff] %vm339_vm1, %v1311_v48  ;;  %v1310_v52 = vadd.f32 %v1306_v50, %v1927_v12 }
 0x3d2   : > { %v1312_v11 = vmax.f32 %v1310_v52, 0.0 }
 0x3d4   : > { %1314 = vst.msk [vmem:[%s217_s11 + $0x8] sm:$0xff] %vm339_vm1, %v1312_v11 }
 0x3d5   : > { %1758 = shalt.err (!%p1755_p3)
}
 0x3d6   : > { %s1759_s25 = scalar_lea.hbm %s2247_s10, 256  ;;  %s1763_s6 = scalar_lea.hbm %s2297_s5, 512 }
 0x3d7   : > { %p1760_p4 = scmp.ne.s32.totalorder %s2247_s10, %s1759_s25  ;;  %p1764_p9 = scmp.lt.s32.totalorder %s2247_s10, %s2297_s5 }
 0x3d8   : > { %p1765_p10 = scmp.lt.s32.totalorder %s1763_s6, %s1759_s25 }
 0x3d9   : > { %p1761_p7 = pnand %p1760_p4, %p1887_p5 }
 0x3da   : > { %p1766_p11 = por %p1765_p10, %p1764_p9 }
 0x3db   : > { %p1762_p8 = pneg %p1761_p7 }
 0x3dd   : > { %p1767_p12 = pnand %p1766_p11, %p1762_p8 }
 0x3df   : > { %1770 = shalt.err (!%p1767_p12)
}
 0x3e0   : > { %s1817_s9 = smov 128   ;;  %s1818_s11 = smov 8  }
 0x3e1   : > { %1617 = dma.vmem_to_hbm [thread:$0]  (%p1887_p5), %s2249_s12, 256, %s2247_s10, %s2252_s22, %s1817_s9, %s1817_s9, %s1818_s11  }
 0x3e2 PF: > { %p1623_p13 = scmp.ge.s32.totalorder %s1805_s21, 2  ;;  %s1344_s13 = sand.u32 1, %s1793_s18  }
 0x3e3   : > { %s1345_s14 = scalar_lea.sflag [#allocation5], %s1344_s13 }
 0x3e4   : > { %p1620_p0 = pnand %p1623_p13, %p1891_p6 }
 0x3e6   : > { %p1621_p1 = pneg %p1620_p0 }
 0x3e8   : > { %1788 = dma.done.wait (%p1621_p1), %s1345_s14, 256  }
 0x3e9   : > { %1790 = vsyncadd (%p1621_p1), %s1345_s14, 4294967040  ;;  %p15_p2 = scmp.ge.s32.totalorder %s1874_s24, 4   ;;  %s2310_s18 = smov %s1797_s19 }
 0x3ea   : > { %s2311_s19 = smov %s1801_s20  ;;  %s2312_s20 = smov %s1885_s27 }
 0x3eb   : > { %s2313_s21 = smov %s1874_s24  ;;  %17 = sbr.rel (!%p15_p2) target bundleno = 3 (0x3), region = 75 }
 0x3f0   :  { %1350 = vsyncpa [#allocation5], 1 }
 0x3f1   :  { %1352 = vsyncpa [#allocation5 + $0x1], 1 }

</bundles_post_ra>
